<compile_context>
chip_gen: v5e
topology: v5e:2x2
jax: 0.10.0
libtpu: 0.0.40
codegen_flags: <defaults>
</compile_context>

<pallas_src>
import math
import jax
import jax.numpy as jnp
from jax.experimental import pallas as pl
from jax.experimental.pallas import tpu as pltpu


KERNEL_TAPS = 9          # SpecialSparseConv kernel_size
DEFAULT_TILE_N = 2048    # rows per grid step; sweep 2048/4096 at realistic N


def _round_up(x, m):
    return ((x + m - 1) // m) * m


def _padded_tile_bytes(shape, dtype):
    """VMEM bytes of one (2D) tile including sublane/lane padding."""
    item = jnp.dtype(dtype).itemsize
    sub = max(1, 32 // item)                  # f32 -> 8 sublanes, bf16 -> 16
    s2 = shape[-2] if len(shape) >= 2 else 1
    s1 = shape[-1]
    lead = 1
    for d in shape[:-2]:
        lead *= d
    return lead * _round_up(s2, sub) * _round_up(s1, 128) * item


# ---------------------------------------------------------------------------
# Pallas kernels: one fused MXU dot per row tile (+ a second dot for the
# split-channel branch) + bias + relu.  All normalization is pre-folded into
# the streamed per-row weights, so there are no (tn,1) side streams.
# ---------------------------------------------------------------------------
def _simple_kernel(x_ref, w_ref, b_ref, out_ref):
    # x: [TN, K*C_in] (bf16, already weighted), w: [K*C_in, C_out] (bf16)
    acc = jnp.dot(x_ref[...], w_ref[...], preferred_element_type=jnp.float32)
    out_ref[...] = jnp.maximum(acc + b_ref[...], 0.0).astype(out_ref.dtype)


def _split_kernel(x_ref, wn_ref, exp_ref, wa_ref, wb_ref, b_ref, out_ref):
    # x  : [TN, K*C_in] bf16, mask-weighted gathered features (shared slab)
    # wn : [TN, K]      bf16, normalized importance weights mask*imp/denom
    # exp: [K, K*C_in]  bf16 0/1 tap->lane expansion (avoids in-kernel reshape)
    # wa : [K*C_in, C_out] bf16, conv1a weights, zero in normalized columns
    # wb : [K*C_in, C_out] bf16, conv1b weights, zero in un-normalized columns
    x = x_ref[...]
    acc = jnp.dot(x, wa_ref[...], preferred_element_type=jnp.float32)
    # Expand per-tap normalized importance to per-(tap, channel) lanes with a
    # tiny 0/1 matmul (exact copy, MXU slack is huge), then the conv1b half.
    imp_exp = jnp.dot(wn_ref[...], exp_ref[...],
                      preferred_element_type=jnp.float32).astype(x.dtype)
    acc = acc + jnp.dot(x * imp_exp, wb_ref[...],
                        preferred_element_type=jnp.float32)
    out_ref[...] = jnp.maximum(acc + b_ref[...], 0.0).astype(out_ref.dtype)


# ---------------------------------------------------------------------------
# pallas_call wrapper: row-tile the point dimension (ragged last block), keep
# the small weight / bias / expansion operands grid-invariant.
# ---------------------------------------------------------------------------
def _run_conv(x, weight, bias, *, wnorm=None, expand=None, w_b=None,
              tile_n=DEFAULT_TILE_N):
    N, KC = x.shape
    c_out = weight.shape[1]
    split = w_b is not None

    tn = max(8, min(tile_n, _round_up(N, 8)))
    grid = (pl.cdiv(N, tn),)

    inputs, in_specs, tiles = [], [], []

    def add(arr, block, index_map):
        inputs.append(arr)
        in_specs.append(pl.BlockSpec(block, index_map))
        tiles.append((block, arr.dtype))

    add(x, (tn, KC), lambda i: (i, 0))
    if split:
        K = wnorm.shape[1]
        add(wnorm, (tn, K), lambda i: (i, 0))
        add(expand, expand.shape, lambda i: (0, 0))
    add(weight, weight.shape, lambda i: (0, 0))
    if split:
        add(w_b, w_b.shape, lambda i: (0, 0))
    add(bias.reshape(1, c_out), (1, c_out), lambda i: (0, 0))
    tiles.append(((tn, c_out), jnp.float32))          # output tile

    # Explicit scoped-VMEM budget: double-buffered tiles (+ margin), capped so
    # it stays safe on v7x's 64 MiB/TC while leaving headroom.
    est = 2 * sum(_padded_tile_bytes(s, d) for s, d in tiles)
    vmem_limit = int(min(max(2 * est + (8 << 20), 32 << 20), 48 << 20))

    out = pl.pallas_call(
        _split_kernel if split else _simple_kernel,
        grid=grid,
        in_specs=in_specs,
        out_specs=pl.BlockSpec((tn, c_out), lambda i: (i, 0)),
        out_shape=jax.ShapeDtypeStruct((N, c_out), jnp.float32),
        compiler_params=pltpu.CompilerParams(
            dimension_semantics=("parallel",),
            vmem_limit_bytes=vmem_limit),
    )(*inputs)
    return out


# ---------------------------------------------------------------------------
# Deterministic parameter init (synthetic; no checkpoint load).
# ---------------------------------------------------------------------------
def _init_conv_params(seed, K, c_in, filters):
    kw, kb = jax.random.split(jax.random.PRNGKey(seed))
    scale = 1.0 / math.sqrt(K * c_in)
    w = scale * jax.random.normal(kw, (K, c_in, filters), jnp.float32)
    b = 0.01 * jax.random.normal(kb, (filters,), jnp.float32)
    return w, b


class SparseConvTransitionBlock:
    """JAX/Pallas port of the torch SparseConvTransitionBlock forward pass."""

    KERNEL_SIZE = KERNEL_TAPS

    def __init__(self, input_channels, output_channels, normalized_channels=0,
                 tile_n=DEFAULT_TILE_N):
        self.input_channels = input_channels
        self.output_channels = output_channels
        self.normalized_channels = normalized_channels
        self.tile_n = tile_n
        K = self.KERNEL_SIZE

        if normalized_channels == 'all' or (
                not isinstance(normalized_channels, str)
                and normalized_channels >= output_channels):
            self.conv1 = _init_conv_params(1, K, input_channels, output_channels)
        elif normalized_channels and normalized_channels < output_channels:
            self.conv1a = _init_conv_params(1, K, input_channels,
                                            output_channels - normalized_channels)
            self.conv1b = _init_conv_params(2, K, input_channels, normalized_channels)
        else:
            self.conv1 = _init_conv_params(1, K, input_channels, output_channels)

    def __call__(self, feats, neighbors, importance=None):
        N, C_in = feats.shape
        K = self.KERNEL_SIZE
        KC = K * C_in
        C_out = self.output_channels
        nc = self.normalized_channels

        # glue: the data-dependent gather stays in plain JAX; the mask /
        # normalized-importance weighting below fuses into the gather fusion.
        # TODO(synk): move this gather on-chip (feats resident in VMEM) once the
        # Mosaic lowering of an in-kernel row gather is validated.
        idx = jnp.clip(neighbors['neighbors_index'], 0, N - 1).astype(jnp.int32)
        mask = neighbors['neighbors_mask'].astype(jnp.float32)
        g = feats.astype(jnp.float32)[idx]                          # [N, K, C_in]

        full_norm = nc == 'all' or (
            not isinstance(nc, str) and nc and nc >= C_out)

        if full_norm:
            # fully normalized single conv: fold 1/denom into the per-tap
            # weights in the wrapper -> the kernel is a plain matmul.
            w, b = self.conv1
            imp = importance if importance is not None else jnp.ones((N,), jnp.float32)
            wimp = mask * imp[idx]                                  # [N, K]
            denom = jnp.sum(wimp, axis=-1)                          # f32 out_importance
            inv = jnp.where(denom > 0.0, 1.0 / jnp.maximum(denom, 1e-20), 1.0)
            wnorm = wimp * inv[:, None]
            x = (g * wnorm[:, :, None]).reshape(N, KC).astype(jnp.bfloat16)
            feats1 = _run_conv(x, w.reshape(KC, C_out).astype(jnp.bfloat16), b,
                               tile_n=self.tile_n)
            return feats1, denom

        elif nc and nc < C_out:
            # split branch: conv1a (un-normalized, mask only) + conv1b
            # (importance-normalized), fused into ONE pallas_call.
            wa, ba = self.conv1a
            wb, bb = self.conv1b
            c_a = C_out - nc
            imp = importance if importance is not None else jnp.ones((N,), jnp.float32)
            wimp = mask * imp[idx]
            denom = jnp.sum(wimp, axis=-1)                          # f32 out_importance
            inv = jnp.where(denom > 0.0, 1.0 / jnp.maximum(denom, 1e-20), 1.0)
            wnorm = (wimp * inv[:, None]).astype(jnp.bfloat16)      # [N, K]
            x = (g * mask[:, :, None]).reshape(N, KC).astype(jnp.bfloat16)
            wa_pad = jnp.concatenate(
                [wa.reshape(KC, c_a), jnp.zeros((KC, nc), jnp.float32)],
                axis=1).astype(jnp.bfloat16)
            wb_pad = jnp.concatenate(
                [jnp.zeros((KC, c_a), jnp.float32), wb.reshape(KC, nc)],
                axis=1).astype(jnp.bfloat16)
            bias = jnp.concatenate([ba, bb], axis=0)
            # expand[k, k*C_in + c] = 1 : maps per-tap weight onto lanes
            expand = jnp.repeat(jnp.eye(K, dtype=jnp.bfloat16), C_in, axis=1)
            feats1 = _run_conv(x, wa_pad, bias, wnorm=wnorm, expand=expand,
                               w_b=wb_pad, tile_n=self.tile_n)
            return feats1, denom

        else:
            # un-normalized single conv (importance unused, matching torch forward)
            w, b = self.conv1
            x = (g * mask[:, :, None]).reshape(N, KC).astype(jnp.bfloat16)
            feats1 = _run_conv(x, w.reshape(KC, C_out).astype(jnp.bfloat16), b,
                               tile_n=self.tile_n)
            return feats1


if __name__ == "__main__":
    key = jax.random.PRNGKey(0)
    k1, k2, k3, k4 = jax.random.split(key, 4)

    N, C_IN, C_OUT, K, NORM_CH = 80, 4, 8, KERNEL_TAPS, 3

    feats = jax.random.normal(k1, (N, C_IN), jnp.float32)
    neighbors_index = jax.random.randint(k2, (N, K), 0, N, jnp.int32)
    neighbors_mask = (jax.random.uniform(k3, (N, K)) < 0.7).astype(jnp.float32)
    # tap 0 is always the point itself (guarantees >= 1 valid neighbor everywhere)
    neighbors_index = neighbors_index.at[:, 0].set(jnp.arange(N, dtype=jnp.int32))
    neighbors_mask = neighbors_mask.at[:, 0].set(1.0)
    importance = jax.random.uniform(k4, (N,), jnp.float32, minval=0.1, maxval=1.0)

    neighbors = {"neighbors_index": neighbors_index, "neighbors_mask": neighbors_mask}

    # --- main path: split-channel branch; tile_n=32 exercises a multi-step
    #     grid with a ragged last block (80 = 32 + 32 + 16) ---
    block = SparseConvTransitionBlock(C_IN, C_OUT, normalized_channels=NORM_CH,
                                      tile_n=32)
    feats1, out_importance = block(feats, neighbors, importance)
    jax.block_until_ready((feats1, out_importance))
    assert feats1.shape == (N, C_OUT), feats1.shape
    assert out_importance.shape == (N,), out_importance.shape

    # pure-JAX f32 reference of the assumed SpecialSparseConv semantics
    idx = jnp.clip(neighbors_index, 0, N - 1)
    g = feats[idx]
    wa, ba = block.conv1a
    wb, bb = block.conv1b
    ref_a = jax.nn.relu(jnp.einsum('nk,nkc,kcf->nf', neighbors_mask, g, wa) + ba)
    wimp = neighbors_mask * importance[idx]
    denom = wimp.sum(-1)
    inv = jnp.where(denom > 0, 1.0 / denom, 1.0)
    sb = jnp.einsum('nk,nkc,kcf->nf', wimp, g, wb) * inv[:, None]
    ref_b = jax.nn.relu(sb + bb)
    ref = jnp.concatenate([ref_a, ref_b], axis=-1)
    assert bool(jnp.allclose(feats1, ref, rtol=3e-2, atol=3e-2)), "split branch mismatch"
    assert bool(jnp.allclose(out_importance, denom, rtol=1e-5, atol=1e-5))

    # --- fully normalized branch (default tile_n: single grid step) ---
    block_all = SparseConvTransitionBlock(C_IN, C_OUT, normalized_channels='all')
    f_all, imp_all = block_all(feats, neighbors, importance)
    w1, b1 = block_all.conv1
    ref_all = jax.nn.relu(
        jnp.einsum('nk,nkc,kcf->nf', wimp, g, w1) * inv[:, None] + b1)
    jax.block_until_ready((f_all, imp_all))
    assert f_all.shape == (N, C_OUT) and imp_all.shape == (N,)
    assert bool(jnp.allclose(f_all, ref_all, rtol=3e-2, atol=3e-2)), "'all' branch mismatch"
    assert bool(jnp.allclose(imp_all, denom, rtol=1e-5, atol=1e-5))

    # --- un-normalized branch ---
    block_plain = SparseConvTransitionBlock(C_IN, C_OUT, normalized_channels=0)
    f_plain = block_plain(feats, neighbors)
    w0, b0 = block_plain.conv1
    ref_plain = jax.nn.relu(jnp.einsum('nk,nkc,kcf->nf', neighbors_mask, g, w0) + b0)
    jax.block_until_ready(f_plain)
    assert f_plain.shape == (N, C_OUT)
    assert bool(jnp.allclose(f_plain, ref_plain, rtol=3e-2, atol=3e-2)), "plain branch mismatch"

    print("KERNEL_OK")
</pallas_src>

<mosaic_0001>
module attributes {stable_mosaic.version = 11 : i64} {
  func.func @_split_kernel(%arg0: i32, %arg1: memref<32x36xbf16, #tpu.memory_space<vmem>>, %arg2: memref<32x9xbf16, #tpu.memory_space<vmem>>, %arg3: memref<9x36xbf16, #tpu.memory_space<vmem>>, %arg4: memref<36x8xbf16, #tpu.memory_space<vmem>>, %arg5: memref<36x8xbf16, #tpu.memory_space<vmem>>, %arg6: memref<1x8xf32, #tpu.memory_space<vmem>>, %arg7: memref<32x8xf32, #tpu.memory_space<vmem>>) attributes {dimension_semantics = [#tpu.dimension_semantics<parallel>], iteration_bounds = array<i64: 3>, scalar_prefetch = 0 : i64, scratch_operands = 0 : i64, tpu.core_type = #tpu.core_type<tc>, window_params = [{transform_indices = @transform_0, window_bounds = array<i64: 32, 36>}, {transform_indices = @transform_1, window_bounds = array<i64: 32, 9>}, {pipeline_mode = #tpu.pipeline_mode<synchronous>, transform_indices = @transform_2, window_bounds = array<i64: 9, 36>}, {pipeline_mode = #tpu.pipeline_mode<synchronous>, transform_indices = @transform_3, window_bounds = array<i64: 36, 8>}, {pipeline_mode = #tpu.pipeline_mode<synchronous>, transform_indices = @transform_4, window_bounds = array<i64: 36, 8>}, {pipeline_mode = #tpu.pipeline_mode<synchronous>, transform_indices = @transform_5, window_bounds = array<i64: 1, 8>}, {transform_indices = @transform_6, window_bounds = array<i64: 32, 8>}]} {
    %c0 = arith.constant 0 : index
    %c0_0 = arith.constant 0 : index
    %0 = vector.load %arg1[%c0, %c0_0] : memref<32x36xbf16, #tpu.memory_space<vmem>>, vector<32x36xbf16>
    %c0_1 = arith.constant 0 : index
    %c0_2 = arith.constant 0 : index
    %1 = vector.load %arg4[%c0_1, %c0_2] : memref<36x8xbf16, #tpu.memory_space<vmem>>, vector<36x8xbf16>
    %cst = arith.constant dense<0.000000e+00> : vector<32x8xf32>
    %2 = tpu.matmul %0, %1, %cst {dimension_numbers = #tpu.dot_dimension_numbers<[1], [0], [0], [1], [0, 0, 1, 1], [], []>} : vector<32x36xbf16>, vector<36x8xbf16>, vector<32x8xf32> -> vector<32x8xf32>
    %c0_3 = arith.constant 0 : index
    %c0_4 = arith.constant 0 : index
    %3 = vector.load %arg2[%c0_3, %c0_4] : memref<32x9xbf16, #tpu.memory_space<vmem>>, vector<32x9xbf16>
    %c0_5 = arith.constant 0 : index
    %c0_6 = arith.constant 0 : index
    %4 = vector.load %arg3[%c0_5, %c0_6] : memref<9x36xbf16, #tpu.memory_space<vmem>>, vector<9x36xbf16>
    %cst_7 = arith.constant dense<0.000000e+00> : vector<32x36xf32>
    %5 = tpu.matmul %3, %4, %cst_7 {dimension_numbers = #tpu.dot_dimension_numbers<[1], [0], [0], [1], [0, 0, 1, 1], [], []>} : vector<32x9xbf16>, vector<9x36xbf16>, vector<32x36xf32> -> vector<32x36xf32>
    %6 = arith.truncf %5 : vector<32x36xf32> to vector<32x36xbf16>
    %7 = arith.mulf %0, %6 : vector<32x36xbf16>
    %c0_8 = arith.constant 0 : index
    %c0_9 = arith.constant 0 : index
    %8 = vector.load %arg5[%c0_8, %c0_9] : memref<36x8xbf16, #tpu.memory_space<vmem>>, vector<36x8xbf16>
    %cst_10 = arith.constant dense<0.000000e+00> : vector<32x8xf32>
    %9 = tpu.matmul %7, %8, %cst_10 {dimension_numbers = #tpu.dot_dimension_numbers<[1], [0], [0], [1], [0, 0, 1, 1], [], []>} : vector<32x36xbf16>, vector<36x8xbf16>, vector<32x8xf32> -> vector<32x8xf32>
    %10 = arith.addf %2, %9 : vector<32x8xf32>
    %c0_11 = arith.constant 0 : index
    %c0_12 = arith.constant 0 : index
    %11 = vector.load %arg6[%c0_11, %c0_12] : memref<1x8xf32, #tpu.memory_space<vmem>>, vector<1x8xf32>
    %12 = vector.broadcast %11 : vector<1x8xf32> to vector<32x8xf32>
    %13 = arith.addf %10, %12 : vector<32x8xf32>
    %cst_13 = arith.constant 0.000000e+00 : f32
    %14 = vector.broadcast %cst_13 : f32 to vector<32x8xf32>
    %15 = arith.maximumf %13, %14 : vector<32x8xf32>
    %c0_14 = arith.constant 0 : index
    %c0_15 = arith.constant 0 : index
    %16 = vector.load %arg7[%c0_14, %c0_15] : memref<32x8xf32, #tpu.memory_space<vmem>>, vector<32x8xf32>
    tpu.vector_store %arg7[%c0_14, %c0_15], %15 {strides = array<i32>} : memref<32x8xf32, #tpu.memory_space<vmem>>, vector<32x8xf32>,
    return
  }
  func.func @transform_0(%arg0: i32) -> (i32, i32) {
    %c0_i32 = arith.constant 0 : i32
    %c0_i32_0 = arith.constant 0 : i32
    return %arg0, %c0_i32 : i32, i32
  }
  func.func @transform_1(%arg0: i32) -> (i32, i32) {
    %c0_i32 = arith.constant 0 : i32
    %c0_i32_0 = arith.constant 0 : i32
    return %arg0, %c0_i32 : i32, i32
  }
  func.func @transform_2(%arg0: i32) -> (i32, i32) {
    %c0_i32 = arith.constant 0 : i32
    %c0_i32_0 = arith.constant 0 : i32
    %c0_i32_1 = arith.constant 0 : i32
    return %c0_i32, %c0_i32_0 : i32, i32
  }
  func.func @transform_3(%arg0: i32) -> (i32, i32) {
    %c0_i32 = arith.constant 0 : i32
    %c0_i32_0 = arith.constant 0 : i32
    %c0_i32_1 = arith.constant 0 : i32
    return %c0_i32, %c0_i32_0 : i32, i32
  }
  func.func @transform_4(%arg0: i32) -> (i32, i32) {
    %c0_i32 = arith.constant 0 : i32
    %c0_i32_0 = arith.constant 0 : i32
    %c0_i32_1 = arith.constant 0 : i32
    return %c0_i32, %c0_i32_0 : i32, i32
  }
  func.func @transform_5(%arg0: i32) -> (i32, i32) {
    %c0_i32 = arith.constant 0 : i32
    %c0_i32_0 = arith.constant 0 : i32
    %c0_i32_1 = arith.constant 0 : i32
    return %c0_i32, %c0_i32_0 : i32, i32
  }
  func.func @transform_6(%arg0: i32) -> (i32, i32) {
    %c0_i32 = arith.constant 0 : i32
    %c0_i32_0 = arith.constant 0 : i32
    return %arg0, %c0_i32 : i32, i32
  }
}

</mosaic_0001>

<bundles_post_ra>
// kernel: tpu_custom_call.1
= control target key start
LH: loop header
LB: loop body
LE: loop exit
PB: predicated region body
PF: predicated region fallthrough
CT: control target
= control target key end

     0   :  { %s1054_s21 = smov 0   ;;  %s1056_s22 = smov 0   ;;  %s1194_s0 = inlined_call_operand.vmem [shape: bf16[80,36], index: 0, kind: input, shape index: {}]   ;;  %s1195_s1 = inlined_call_operand.vmem [shape: bf16[80,9], index: 1, kind: input, shape index: {}]   ;;  %s1196_s2 = inlined_call_operand.vmem [shape: bf16[9,36], index: 2, kind: input, shape index: {}]   ;;  %s1197_s3 = inlined_call_operand.vmem [shape: bf16[36,8], index: 3, kind: input, shape index: {}]   ;;  %s1198_s4 = inlined_call_operand.vmem [shape: bf16[36,8], index: 4, kind: input, shape index: {}]   ;;  %s1199_s5 = inlined_call_operand.vmem [shape: f32[1,8], index: 5, kind: input, shape index: {}]   ;;  %s1200_s6 = inlined_call_operand.vmem [shape: f32[80,8], index: 6, kind: output, shape index: {}]  }
   0x1   :  { %s1058_s23 = smov 0  }
   0x2 LB: > { %s1067_s24 = sadd.s32 4294967295, %s984_s23   ;;  %s1069_s25 = sadd.s32 1, %s984_s23   ;;  %s984_s23 = sphi %s1058_s23, %s1207_s23   ;;  %s980_s22 = sphi %s1056_s22, %s1206_s22   ;;  %s976_s21 = sphi %s1054_s21, %s1205_s21  }
   0x3   : > { %s156_s26 = ssub.s32 %s984_s23, %s1069_s25  ;;  %s159_s27 = sadd.s32 1, %s980_s22 }
   0x4   : > { %p157_p0 = scmp.eq.s32.totalorder %s156_s26, 0  ;;  %p169_p1 = scmp.ne.s32.totalorder %s980_s22, %s976_s21 }
   0x5   : > { %p170_p2 = scmp.eq.s32.totalorder %s1067_s24, 2  ;;  %p760_p3 = scmp.ge.s32.totalorder %s984_s23, 1 }
   0x6   : > { %s1077_s28 = scalar_select %p157_p0, %s980_s22, %s159_s27  }
   0x7   : > { %p1079_p4 = por %p170_p2, %p169_p1  ;;  %p240_p5 = scmp.lt.s32.totalorder %s984_s23, 4 }
   0x9   : > { %p241_p6 = pnand %p760_p3, %p240_p5 }
   0xa   : > { %s1090_s10 = sshll.u32 (!%p241_p6), %s1067_s24, 2 }
   0xb   : > { %244 = sbr.rel (%p241_p6) target bundleno = 369 (0x171), region = 44  ;;  %p287_p7 = scmp.lt.s32.totalorder (!%p241_p6), %s1090_s10, 9 }
  0x10   : > { %v776_v0 = vld [vmem:[%s1196_s2] sm:$0xf]  ;;  %v831_v1 = vld [vmem:[%s1196_s2] sm:$0x10]  ;;  %vm353_vm0 = vcmask 1043456   ;;  %vm354_vm1 = vcmask 1044480  }
  0x11   : > { %v777_v2 = vor.u32 %v831_v1, %v776_v0  ;;  %v324_v3 = vld [vmem:[%s1197_s3 + $0x10] sm:$0x3]  ;;  %v1018_v4 = vmov 65535   ;;  %vm424_vm2 = vcmask 1041408   ;;  %s288_s13 = scalar_select %p287_p7, %s1090_s10, 9  ;;  %vm346_vm3 = vcmask 72704  }
  0x12   : > { %v355_v5 = vsel %vm353_vm0, 4294967295, %v1018_v4  ;;  %v466_v6 = vunpack.c.l.b16 %v324_v3  ;;  %v828_v13 = vld [vmem:[%s1197_s3 + $0x8] sm:$0xff]  ;;  %v401_v14 = vld [vmem:[%s1198_s4 + $0x10] sm:$0x3]  ;;  %v827_v17 = vld [vmem:[%s1197_s3] sm:$0xff]  ;;  %vm417_vm4 = vcmask 293888  }
  0x13   : > { %v356_v7 = vsel %vm354_vm1, %v355_v5, 0  ;;  %s763_s14 = sshll.u32 %s288_s13, 2  ;;  %v411_v15 = vunpack.c.l.b16 %v401_v14  ;;  %v833_v20 = vld [vmem:[%s1198_s4 + $0x8] sm:$0xff]  ;;  %v832_v21 = vld [vmem:[%s1198_s4] sm:$0xff]  ;;  %vm512_vm5 = vcmask 64512   ;;  %s834_s19 = sshll.u32 (%p1079_p4), %s1067_s24, 5 }
  0x14   : > { %v358_v8 = vand.u32 %v777_v2, %v356_v7  ;;  %v469_v9 = vpack.c.b16 %v466_v6, %v466_v6  ;;  %s304_s17 = scalar_lea.vmem %s1195_s1, %s763_s14  ;;  %s290_s8 = scalar_lea.vmem %s1194_s0, %s763_s14  ;;  %v929_v48 = vld [vmem:[%s1199_s5] ss:$0 sm:$0xff] }
  0x15   : > { %v829_v11 = vld [vmem:[%s304_s17] sm:$0xff]  ;;  %v830_v12 = vld [vmem:[%s304_s17 + $0x8] sm:$0xff]  ;;  %v414_v16 = vpack.c.b16 %v411_v15, %v411_v15  ;;  %s279_s14 = sand.u32 1, %s976_s21   ;;  %s525_s21 = ssub.s32 (%p1079_p4), 10, %s1090_s10 }
  0x16   : > { %367 = vmatpush.bf16.msra.mxu0 %v358_v8  ;;  %v479_v10 = vsel %vm424_vm2, %v469_v9, 0  ;;  %v825_v19 = vld [vmem:[%s290_s8] sm:$0xff]  ;;  %v826_v22 = vld [vmem:[%s290_s8 + $0x8] sm:$0xff]  ;;  %s761_s17 = sshll.u32 %s279_s14, 5  ;;  %p526_p8 = scmp.lt.s32.totalorder (%p1079_p4), %s525_s21, 4 }
  0x17   : > { %486 = vmatpush.bf16.msra.mxu2 %v479_v10  ;;  %v426_v18 = vsel %vm424_vm2, %v414_v16, 0  ;;  %v316_v25 = vld [vmem:[%s290_s8] sm:$0xff]   ;;  %v318_v37 = vld [vmem:[%s290_s8 + $0x8] sm:$0xff]   ;;  %s1128_s18 = scalar_lea.vmem [#allocation2], %s761_s17   ;;  %s1145_s26 = scalar_lea.vmem (%p1079_p4), %s1200_s6, %s834_s19  }
  0x18   : > { %433 = vmatpush.bf16.msra.mxu1 %v426_v18  ;;  %837 = vmatpush.bf16.msra.mxu3 %v426_v18  ;;  %v383_v27 = vunpack.c.l.bf16 %v316_v25  ;;  %v384_v30 = vunpack.c.h.bf16 %v316_v25  ;;  %v385_v39 = vunpack.c.l.bf16 %v318_v37  ;;  %v386_v42 = vunpack.c.h.bf16 %v318_v37 }
  0x19   : > { %778 = vmatmul.msk.bf16.vlgmr.msra.gmra.mxu0 %vm346_vm3, %v829_v11 }
  0x1b   : > { %487 = vmatpush.bf16.msra.mxu2 %v828_v13 }
  0x1c   : > { %434 = vmatpush.bf16.msra.mxu1 %v833_v20  ;;  %838 = vmatpush.bf16.msra.mxu3 %v833_v20 }
  0x1f   : > { %488 = vmatpush.bf16.msra.mxu2 %v827_v17 }
  0x20   : > { %435 = vmatpush.bf16.msra.mxu1 %v832_v21  ;;  %839 = vmatpush.bf16.msra.mxu3 %v832_v21 }
  0x22   : > { %806 = vmatmul.msk.bf16.vlgmr.msra.gmra.mxu2 %vm417_vm4, %v825_v19 }
  0x29   : > { %779 = vmatmul.msk.bf16.gmra.mxu0 %vm346_vm3, %v830_v12 }
  0x32   : > { %807 = vmatmul.msk.bf16.gmra.mxu2 %vm417_vm4, %v826_v22 }
  0x96   : > { %v369_v23 = vpop.f32.mrf.mxu0 }
  0x97   : > { %v379_v24 = vpack.c.bf16 %v369_v23, %v369_v23 }
  0x99   : > { %v387_v28 = vunpack.c.l.bf16 %v379_v24 }
  0x9b   : > { %v391_v32 = vmul.f32 %v387_v28, %v383_v27 }
  0x9e   : > { %v371_v26 = vpop.f32.mrf.mxu0 }
  0x9f   : > { %v380_v29 = vpack.c.bf16 %v371_v26, %v371_v26 }
  0xa1   : > { %v388_v31 = vunpack.c.l.bf16 %v380_v29 }
  0xa3   : > { %v392_v33 = vmul.f32 %v388_v31, %v384_v30 }
  0xa5   : > { %v395_v34 = vpack.c.bf16 %v392_v33, %v391_v32  ;;  %v490_v47 = vpop.f32.mrf.mxu2 }
  0xa6   : > { %v374_v35 = vpop.f32.mrf.mxu0 }
  0xa7   : > { %788 = vmatmul.msk.bf16.vlgmr.msra.gmra.mxu1 %vm417_vm4, %v395_v34  ;;  %v381_v36 = vpack.c.bf16 %v374_v35, %v374_v35 }
  0xa9   : > { %v389_v40 = vunpack.c.l.bf16 %v381_v36 }
  0xab   : > { %v393_v44 = vmul.f32 %v389_v40, %v385_v39 }
  0xad   : > { %v492_v53 = vpop.f32.mrf.mxu2 }
  0xae   : > { %v376_v38 = vpop.f32.mrf.mxu0 }
  0xaf   : > { %v382_v41 = vpack.c.bf16 %v376_v38, %v376_v38 }
  0xb1   : > { %v390_v43 = vunpack.c.l.bf16 %v382_v41 }
  0xb3   : > { %v394_v45 = vmul.f32 %v390_v43, %v386_v42 }
  0xb5   : > { %v396_v46 = vpack.c.bf16 %v394_v45, %v393_v44  ;;  %v495_v58 = vpop.f32.mrf.mxu2 }
  0xb7   : > { %789 = vmatmul.msk.bf16.vlgmr.msra.gmra.mxu3 %vm417_vm4, %v396_v46 }
  0xbd   : > { %v497_v63 = vpop.f32.mrf.mxu2 }
 0x124   : > { %v437_v49 = vpop.f32.mrf.mxu1 }
 0x125   : > { %v491_v50 = vadd.f32 %v490_v47, %v437_v49 }
 0x127   : > { %v504_v51 = vadd.f32 %v929_v48, %v491_v50 }
 0x129   : > { %v508_v52 = vmax.f32 %v504_v51, 0.0 }
 0x12b   : > { %513 = vst.msk [vmem:[%s1128_s18] sm:$0xff] %vm512_vm5, %v508_v52 }
 0x12c   : > { %v439_v54 = vpop.f32.mrf.mxu1 }
 0x12d   : > { %v493_v55 = vadd.f32 %v492_v53, %v439_v54 }
 0x12f   : > { %v505_v56 = vadd.f32 %v929_v48, %v493_v55 }
 0x131   : > { %v509_v57 = vmax.f32 %v505_v56, 0.0 }
 0x133   : > { %514 = vst.msk [vmem:[%s1128_s18 + $0x8] sm:$0xff] %vm512_vm5, %v509_v57 }
 0x13a   : > { %v442_v59 = vpop.f32.mrf.mxu3 }
 0x13b   : > { %v496_v60 = vadd.f32 %v495_v58, %v442_v59 }
 0x13d   : > { %v506_v61 = vadd.f32 %v929_v48, %v496_v60 }
 0x13f   : > { %v510_v62 = vmax.f32 %v506_v61, 0.0 }
 0x141   : > { %515 = vst.msk [vmem:[%s1128_s18 + $0x10] sm:$0xff] %vm512_vm5, %v510_v62 }
 0x142   : > { %v444_v0 = vpop.f32.mrf.mxu3 }
 0x143   : > { %v498_v1 = vadd.f32 %v497_v63, %v444_v0 }
 0x145   : > { %v507_v2 = vadd.f32 %v929_v48, %v498_v1  ;;  %523 = sbr.rel (!%p1079_p4) target bundleno = 369 (0x171), region = 48 }
 0x147   : > { %v511_v3 = vmax.f32 %v507_v2, 0.0 }
 0x149   : > { %516 = vst.msk [vmem:[%s1128_s18 + $0x18] sm:$0xff] %vm512_vm5, %v511_v3 }
 0x14a   : > { %s1209_s21 = smov (!%p526_p8, %s525_s21), 4 }
 0x14b   : > { %s810_s27 = sshll.u32 %s1209_s21, 3 }
 0x14c   : > { %p813_p9 = scmp.eq.s32.totalorder %s810_s27, 0 }
 0x14d   : > { %s1151_s30 = sshrl.u32 (!%p813_p9), %s1209_s21, 2 }
 0x14e   : > { %534 = sbr.rel (%p813_p9) target bundleno = 369 (0x171), region = 52  ;;  %p814_p10 = scmp.le.s32.totalorder (!%p813_p9), %s1151_s30, 0 }
 0x153   : > { %707 = sbr.rel (%p814_p10) target bundleno = 352 (0x160), region = 131  ;;  %s1202_s24 = smov (!%p814_p10), %s1145_s26 }
 0x154   : > { %s1203_s29 = smov (!%p814_p10), %s1128_s18  ;;  %s1160_s10 = smov (!%p814_p10), 0  }
 0x155   : > { %s998_s7 = smov (!%p814_p10), 0  }
 0x158 LB: >> { %v603_v4 = vld [vmem:[%s992_s29] sm:$0xff]  ;;  %v605_v5 = vld [vmem:[%s992_s29 + $0x8] sm:$0xff]  ;;  %v607_v6 = vld [vmem:[%s992_s29 + $0x10] sm:$0xff]  ;;  %s611_s8 = sadd.s32 1, %s996_s10  ;;  %s597_s7 = sadd.s32 1, %s1000_s7   ;;  %s1000_s7 = sphi %s998_s7, %s597_s7   ;;  %s996_s10 = sphi %s1160_s10, %s1204_s10   ;;  %s992_s29 = sphi %s1203_s29, %s616_s29   ;;  %s988_s24 = sphi %s1202_s24, %s617_s24  }
 0x159   : >> { %604 = vst [vmem:[%s988_s24] sm:$0xff] %v603_v4  ;;  %v609_v7 = vld [vmem:[%s992_s29 + $0x18] sm:$0xff]  ;;  %p612_p11 = scmp.ge.s32.totalorder %s611_s8, %s1151_s30  ;;  %p596_p12 = scmp.ge.s32.totalorder %s597_s7, %s1151_s30 }
 0x15a   : >> { %606 = vst [vmem:[%s988_s24 + $0x8] sm:$0xff] %v605_v5 }
 0x15b   : >> { %608 = vst [vmem:[%s988_s24 + $0x10] sm:$0xff] %v607_v6  ;;  %s1211_s8 = smov (%p612_p11, %s611_s8), 0  ;;  %599 = sbr.rel (!%p596_p12) target bundleno = 344 (0x158), region = 137 }
 0x15c   : >> { %610 = vst [vmem:[%s988_s24 + $0x18] sm:$0xff] %v609_v7  ;;  %s815_s9 = sshll.u32 %s1211_s8, 5  ;;  %s1204_s10 = smov %s1211_s8 }
 0x15d   : >> { %s616_s29 = scalar_lea.vmem %s1128_s18, %s815_s9 [#allocation2]   ;;  %s617_s24 = scalar_lea.vmem %s1145_s26, %s815_s9  }
 0x160 PF: > { %s1176_s11 = sand.u32 3, %s1209_s21   ;;  %s835_s12 = sshll.u32 %s1151_s30, 5 }
 0x161   : > { %s622_s13 = scalar_lea.vmem %s1128_s18, %s835_s12 [#allocation2]   ;;  %s624_s14 = scalar_lea.vmem %s1145_s26, %s835_s12  }
 0x162   : > { %p820_p13 = scmp.le.s32.totalorder %s1176_s11, 0 }
 0x163   : > { %s1002_s15 = smov (!%p820_p13), %s624_s14   ;;  %s1006_s16 = smov (!%p820_p13), %s622_s13  }
 0x164   : > { %721 = sbr.rel (%p820_p13) target bundleno = 369 (0x171), region = 142  ;;  %s1010_s17 = smov (!%p820_p13), 0  }
 0x165   : > { %s1014_s19 = smov (!%p820_p13), 0  }
 0x169 LB: >> { %v634_v8 = vld [vmem:[%s1008_s16] sm:$0xff]  ;;  %s636_s21 = sadd.s32 1, %s1012_s17  ;;  %s628_s19 = sadd.s32 1, %s1016_s19   ;;  %s1016_s19 = sphi %s1014_s19, %s628_s19   ;;  %s1012_s17 = sphi %s1010_s17, %s1011_s17   ;;  %s1008_s16 = sphi %s1006_s16, %s641_s16   ;;  %s1004_s15 = sphi %s1002_s15, %s642_s15  }
 0x16a   : >> { %635 = vst [vmem:[%s1004_s15] sm:$0xff] %v634_v8  ;;  %p637_p0 = scmp.ge.s32.totalorder %s636_s21, %s1176_s11  ;;  %p627_p1 = scmp.ge.s32.totalorder %s628_s19, %s1176_s11 }
 0x16c   : >> { %s1213_s21 = smov (%p637_p0, %s636_s21), 0  ;;  %630 = sbr.rel (!%p627_p1) target bundleno = 361 (0x169), region = 148 }
 0x16d   : >> { %s821_s18 = sshll.u32 %s1213_s21, 3  ;;  %s1011_s17 = smov %s1213_s21  }
 0x16e   : >> { %s641_s16 = scalar_lea.vmem %s622_s13, %s821_s18 [#allocation2]   ;;  %s642_s15 = scalar_lea.vmem %s624_s14, %s821_s18  }
 0x171 PF: > { %p13_p2 = scmp.ge.s32.totalorder %s1069_s25, 5   ;;  %s1205_s21 = smov %s980_s22 }
 0x172   : > { %s1206_s22 = smov %s1077_s28  ;;  %s1207_s23 = smov %s1069_s25 }
 0x173   :  { %15 = sbr.rel (!%p13_p2) target bundleno = 2 (0x2), region = 159 }

</bundles_post_ra>
